<compile_context>
chip_gen: v6e
topology: v6e:2x2x1
jax: 0.10.0
libtpu: 0.0.40
codegen_flags: <defaults>
</compile_context>

<pallas_src>
import jax
import jax.numpy as jnp
from jax.experimental import pallas as pl
from jax.experimental.pallas import tpu as pltpu


def _round_up(x, m):
    return ((x + m - 1) // m) * m


def _fused_embed_kernel(ids_ref, table_ref, out_ref):
    # ids_ref:   [TN, F]        int32, per-feature ids already offset into the fused vocab
    # table_ref: [Vp, D_total]  f32, block-diagonal fused embedding table (VMEM resident)
    # out_ref:   [TN, D_total]  f32
    ids = ids_ref[...]
    tn = out_ref.shape[0]
    vp = table_ref.shape[0]
    num_features = ids.shape[1]
    iota = jax.lax.broadcasted_iota(jnp.int32, (tn, vp), 1)          # [TN, Vp]
    # Multi-hot: one 1 per feature's vocab block.  Feature column blocks of the
    # fused table are disjoint, so multihot @ table == concat of per-feature gathers.
    hot = iota == ids[:, 0:1]
    for f in range(1, num_features):
        hot = hot | (iota == ids[:, f:f + 1])
    # precision=HIGHEST keeps the f32 one-hot selection bit-exact vs. a gather.
    out_ref[...] = jnp.dot(hot.astype(table_ref.dtype), table_ref[...],
                           preferred_element_type=jnp.float32,
                           precision=jax.lax.Precision.HIGHEST)


class WordFeaturePallas:
    """JAX/Pallas port of WordFeature.  The fused table is built once at init
    (was previously rebuilt — zeros + F scatters into a Vp*Dp HBM array — on
    every forward call)."""

    def __init__(self, feature_names, tables):
        self.feature_names = list(feature_names)
        self.feature_sizes = {n: int(tables[n].shape[0]) for n in self.feature_names}
        self.feature_dims = {n: int(tables[n].shape[1]) for n in self.feature_names}

        row_off, col_off = {}, {}
        v_total = d_total = 0
        for name in self.feature_names:
            v, d = tables[name].shape
            row_off[name], col_off[name] = v_total, d_total
            v_total += int(v)
            d_total += int(d)
        vp = _round_up(v_total, 128)   # lane-aligned compare / contraction axis
        fused = jnp.zeros((vp, d_total), jnp.float32)
        for name in self.feature_names:
            v, d = tables[name].shape
            fused = fused.at[row_off[name]:row_off[name] + v,
                             col_off[name]:col_off[name] + d].set(
                                 tables[name].astype(jnp.float32))
        self.fused_table = fused
        self.row_off = row_off
        self.d_total = d_total
        self.vp = vp

    # ---- tiling / VMEM-budget heuristics ------------------------------------
    def _choose_tile_n(self, n):
        n8 = _round_up(max(n, 1), 8)
        if n8 <= 8:
            return 8
        # >=2 grid steps so the "parallel" token axis can be megacore-sharded
        # on v7x (2 TensorCores); cap at 256 rows per tile.
        tile_n = min(256, _round_up(pl.cdiv(n8, 2), 8))
        # Keep the per-tile [TN, Vp] iota + multi-hot intermediates to a few MiB
        # so the 2-deep output pipeline fits v7x's smaller VMEM.
        while tile_n > 8 and 2 * tile_n * self.vp * 4 > (8 << 20):
            tile_n = max(8, _round_up(tile_n // 2, 8))
        return tile_n

    def __call__(self, input_dict):
        """Mirrors WordFeature.forward: per-feature lookup + concat on dim 2."""
        bs, max_len = input_dict[self.feature_names[0]].shape
        num_features = len(self.feature_names)
        n = bs * max_len

        # Stack ids to [N, F]; clip (matches gather clamping for bad ids) and
        # shift each feature's ids into its block of the fused vocab.
        cols = []
        for name in self.feature_names:
            v = self.feature_sizes[name]
            ids_f = jnp.clip(input_dict[name].reshape(-1).astype(jnp.int32), 0, v - 1)
            cols.append(ids_f + self.row_off[name])
        ids = jnp.stack(cols, axis=1)                                  # [N, F]

        tile_n = self._choose_tile_n(n)
        n_pad = _round_up(n, tile_n)
        if n_pad != n:
            ids = jnp.pad(ids, ((0, n_pad - n), (0, 0)))               # padded rows -> id 0

        vp, d_total = self.vp, self.d_total
        # Explicit scoped-VMEM budget: resident table + double-buffered ids/out
        # tiles + in-kernel intermediates, with 2x headroom.  v5e's scoped
        # default is only 16 MiB, so this unlocks larger resident tables there.
        per_step = 2 * tile_n * (num_features + d_total + vp) * 4
        vmem_limit = int(min(96 << 20,
                             max(2 * (vp * d_total * 4 + per_step), 32 << 20)))

        out = pl.pallas_call(
            _fused_embed_kernel,
            out_shape=jax.ShapeDtypeStruct((n_pad, d_total), jnp.float32),
            grid=(n_pad // tile_n,),
            in_specs=[
                # token-id tile: last dim == full array dim (F), second-last 8-aligned
                pl.BlockSpec((tile_n, num_features), lambda i: (i, 0)),
                # whole fused table resident in VMEM once (no per-step double buffer)
                pl.BlockSpec(memory_space=pltpu.MemorySpace.VMEM),
            ],
            # Output last dim = D_total (full array dim): no 128-column padding,
            # no wrapper column-slice pass -> ~2.7x fewer HBM output bytes at D=48.
            out_specs=pl.BlockSpec((tile_n, d_total), lambda i: (i, 0)),
            compiler_params=pltpu.CompilerParams(
                dimension_semantics=("parallel",),
                vmem_limit_bytes=vmem_limit),
            cost_estimate=pl.CostEstimate(
                flops=2 * n_pad * vp * d_total,
                transcendentals=0,
                bytes_accessed=(n_pad * num_features * 4
                                + vp * d_total * 4
                                + n_pad * d_total * 4)),
        )(ids, self.fused_table)

        if n_pad != n:
            out = out[:n]
        return out.reshape(bs, max_len, d_total)


if __name__ == "__main__":
    # ---- deterministic parameter / input construction ----
    feature_names = ["word", "pos"]
    feature_size_dict = {"word": 50, "pos": 20}   # vocab sizes
    feature_dim_dict = {"word": 32, "pos": 16}    # embedding dims
    bs, max_len = 2, 8

    key = jax.random.PRNGKey(0)

    # init_embedding-style init: uniform(-sqrt(3/dim), sqrt(3/dim))
    tables = {}
    for name in feature_names:
        key, sub = jax.random.split(key)
        v, d = feature_size_dict[name], feature_dim_dict[name]
        scale = (3.0 / d) ** 0.5
        tables[name] = jax.random.uniform(sub, (v, d), jnp.float32, -scale, scale)

    # input_dict: {feature_name: int ids [bs, max_len]}
    input_dict = {}
    for name in feature_names:
        key, sub = jax.random.split(key)
        input_dict[name] = jax.random.randint(
            sub, (bs, max_len), 0, feature_size_dict[name], jnp.int32)

    # ---- build module (one-time fused-table pack) and run the Pallas kernel ----
    module = WordFeaturePallas(feature_names, tables)
    out = module(input_dict)
    out = jax.block_until_ready(out)

    # ---- correctness check against plain-JAX reference gather ----
    ref = jnp.concatenate(
        [tables[n][input_dict[n]] for n in feature_names], axis=2
    )
    assert out.shape == (bs, max_len, sum(feature_dim_dict.values()))
    assert jnp.allclose(out, ref, atol=1e-6), "Pallas output mismatch vs reference"

    print("KERNEL_OK")
</pallas_src>

<mosaic_0001>
module attributes {stable_mosaic.version = 11 : i64} {
  func.func @_fused_embed_kernel(%arg0: i32, %arg1: memref<8x2xi32, #tpu.memory_space<vmem>>, %arg2: memref<128x48xf32, #tpu.memory_space<vmem>>, %arg3: memref<8x48xf32, #tpu.memory_space<vmem>>) attributes {dimension_semantics = [#tpu.dimension_semantics<parallel>], iteration_bounds = array<i64: 2>, scalar_prefetch = 0 : i64, scratch_operands = 0 : i64, tpu.core_type = #tpu.core_type<tc>, window_params = [{transform_indices = @transform_0, window_bounds = array<i64: 8, 2>}, {pipeline_mode = #tpu.pipeline_mode<synchronous>, transform_indices = @transform_1, window_bounds = array<i64: 128, 48>}, {transform_indices = @transform_2, window_bounds = array<i64: 8, 48>}]} {
    %c0 = arith.constant 0 : index
    %c0_0 = arith.constant 0 : index
    %0 = vector.load %arg1[%c0, %c0_0] : memref<8x2xi32, #tpu.memory_space<vmem>>, vector<8x2xi32>
    %1 = tpu.iota {dimensions = array<i32: 1>} : vector<8x128xi32>
    %2 = vector.extract_strided_slice %0 {offsets = [0, 0], sizes = [8, 1], strides = [1, 1]} : vector<8x2xi32> to vector<8x1xi32>
    %3 = vector.broadcast %2 : vector<8x1xi32> to vector<8x128xi32>
    %4 = arith.cmpi eq, %1, %3 : vector<8x128xi32>
    %5 = vector.extract_strided_slice %0 {offsets = [0, 1], sizes = [8, 1], strides = [1, 1]} : vector<8x2xi32> to vector<8x1xi32>
    %6 = vector.broadcast %5 : vector<8x1xi32> to vector<8x128xi32>
    %7 = arith.cmpi eq, %1, %6 : vector<8x128xi32>
    %8 = arith.ori %4, %7 : vector<8x128xi1>
    %9 = arith.extui %8 : vector<8x128xi1> to vector<8x128xi32>
    %10 = arith.sitofp %9 : vector<8x128xi32> to vector<8x128xf32>
    %c0_1 = arith.constant 0 : index
    %c0_2 = arith.constant 0 : index
    %11 = vector.load %arg2[%c0_1, %c0_2] : memref<128x48xf32, #tpu.memory_space<vmem>>, vector<128x48xf32>
    %cst = arith.constant dense<0.000000e+00> : vector<8x48xf32>
    %12 = tpu.matmul %10, %11, %cst {dimension_numbers = #tpu.dot_dimension_numbers<[1], [0], [0], [1], [0, 0, 1, 1], [], []>, precision = #tpu.contract_precision<fp32>} : vector<8x128xf32>, vector<128x48xf32>, vector<8x48xf32> -> vector<8x48xf32>
    %c0_3 = arith.constant 0 : index
    %c0_4 = arith.constant 0 : index
    %13 = vector.load %arg3[%c0_3, %c0_4] : memref<8x48xf32, #tpu.memory_space<vmem>>, vector<8x48xf32>
    tpu.vector_store %arg3[%c0_3, %c0_4], %12 {strides = array<i32>} : memref<8x48xf32, #tpu.memory_space<vmem>>, vector<8x48xf32>,
    return
  }
  func.func @transform_0(%arg0: i32) -> (i32, i32) {
    %c0_i32 = arith.constant 0 : i32
    %c0_i32_0 = arith.constant 0 : i32
    return %arg0, %c0_i32 : i32, i32
  }
  func.func @transform_1(%arg0: i32) -> (i32, i32) {
    %c0_i32 = arith.constant 0 : i32
    %c0_i32_0 = arith.constant 0 : i32
    %c0_i32_1 = arith.constant 0 : i32
    return %c0_i32, %c0_i32_0 : i32, i32
  }
  func.func @transform_2(%arg0: i32) -> (i32, i32) {
    %c0_i32 = arith.constant 0 : i32
    %c0_i32_0 = arith.constant 0 : i32
    return %arg0, %c0_i32 : i32, i32
  }
}

</mosaic_0001>

<bundles_post_ra>
// kernel: tpu_custom_call.1
= control target key start
LH: loop header
LB: loop body
LE: loop exit
PB: predicated region body
PF: predicated region fallthrough
CT: control target
= control target key end

     0   :  { %7 = vsyncpa [#allocation3], 0  ;;  %s1844_s0 = inlined_call_operand.vmem [shape: s32[16,2], index: 0, kind: input, shape index: {}]   ;;  %s1845_s1 = inlined_call_operand.vmem [shape: f32[128,48], index: 1, kind: input, shape index: {}]   ;;  %s1846_s2 = inlined_call_operand.hbm [shape: f32[16,48], index: 2, kind: output, shape index: {}]  }
   0x1   :  { %9 = vsyncpa [#allocation3 + $0x1], 0  ;;  %s1340_s9 = smov 0   ;;  %s1342_s10 = smov 0  }
   0x2   :  { %s1344_s11 = smov 0   ;;  %s1346_s12 = smov 0  }
   0x3 LB: > { %s1361_s13 = sadd.s32 4294967295, %s1317_s12   ;;  %s885_s14 = sadd.s32 4294967294, %s1317_s12   ;;  %s1317_s12 = sphi %s1346_s12, %s1854_s12   ;;  %s1313_s11 = sphi %s1344_s11, %s1853_s11   ;;  %s1309_s10 = sphi %s1342_s10, %s1852_s10   ;;  %s1305_s9 = sphi %s1340_s9, %s1851_s9  }
   0x4   : > { %s1365_s15 = sadd.s32 1, %s1317_s12   ;;  %s69_s16 = sadd.s32 1, %s1313_s11 }
   0x5   : > { %s66_s17 = ssub.s32 %s1317_s12, %s1365_s15  ;;  %p79_p0 = scmp.ne.s32.totalorder %s1313_s11, %s1309_s10 }
   0x6   : > { %p67_p1 = scmp.eq.s32.totalorder %s66_s17, 0  ;;  %p80_p2 = scmp.eq.s32.totalorder %s1361_s13, 1 }
   0x7   : > { %p85_p3 = scmp.ne.s32.totalorder %s1309_s10, %s1305_s9  ;;  %p86_p4 = scmp.eq.s32.totalorder %s885_s14, 1 }
   0x8   : > { %s1376_s18 = scalar_select %p67_p1, %s1313_s11, %s69_s16  }
   0x9   : > { %p1378_p5 = por %p80_p2, %p79_p0  ;;  %p1382_p6 = por %p86_p4, %p85_p3 }
   0xa   : > { %p888_p7 = scmp.ge.s32.totalorder %s1317_s12, 1  ;;  %p114_p8 = scmp.lt.s32.totalorder %s1317_s12, 3 }
   0xc   : > { %p115_p9 = pnand %p888_p7, %p114_p8 }
   0xd   : > { %p135_p10 = scmp.lt.s32.totalorder (!%p115_p9), %s1361_s13, 1  ;;  %s132_s17 = sand.u32 (!%p115_p9), 1, %s1309_s10  }
   0xe   : > { %118 = sbr.rel (%p115_p9) target bundleno = 440 (0x1b8), region = 28  ;;  %s889_s21 = sshll.u32 (!%p115_p9), %s132_s17, 3 }
   0xf   : > { %s134_s23 = scalar_lea.vmem (!%p115_p9), [#allocation2], %s889_s21  ;;  %s813_s28 = scalar_lea.sflag (!%p115_p9), [#allocation3], %s132_s17 }
  0x10   : > { %s826_s24 = sshll.u32 (!%p115_p9), %s134_s23, 4  ;;  %s1324_s30 = smov (!%p115_p9), [#allocation2]   ;;  %s827_s24 = int_to_ptr.vmem [resolvable:$true] %s826_s24 }
  0x11   : > { %s1257_s29 = scalar_lea.vmem (!%p115_p9), %s827_s24, 128 }
  0x12   : > { %p1258_p11 = scmp.ne.s32.totalorder (!%p115_p9), %s827_s24, %s1257_s29 }
  0x13   : > { %v168_v0 = vld [vmem:[%s1845_s1 + $0x78] sm:$0xff]  ;;  %v167_v1 = vld [vmem:[%s1845_s1 + $0x70] sm:$0xff]  ;;  %v1319_v2 = vmov 0   ;;  %v1320_v3 = vmov 0.0   ;;  %v166_v6 = vld [vmem:[%s1845_s1 + $0x68] sm:$0xff]  ;;  %s136_s3 = scalar_select %p135_p10, %s1361_s13, 1 }
  0x14   : > { %1255 = vset.pattern.permute.xlu0 %v1319_v2  ;;  %1036 = vmatprep.subr.mxu1 %v1320_v3  ;;  %v1396_v4 = vand.u32 4294901760, %v168_v0  ;;  %v1398_v5 = vand.u32 4294901760, %v167_v1  ;;  %v165_v7 = vld [vmem:[%s1845_s1 + $0x60] sm:$0xff]  ;;  %v164_v8 = vld [vmem:[%s1845_s1 + $0x58] sm:$0xff]  ;;  %v1410_v9 = vand.u32 4294901760, %v166_v6  ;;  %v163_v12 = vld [vmem:[%s1845_s1 + $0x50] sm:$0xff]  ;;  %p1259_p12 = pnand %p1258_p11, %p1378_p5 }
  0x15   : > { %v1412_v10 = vand.u32 4294901760, %v165_v7  ;;  %1001 = vmatprep.subr.mxu0 %v1320_v3  ;;  %v1415_v11 = vand.u32 4294901760, %v164_v8  ;;  %v162_v13 = vld [vmem:[%s1845_s1 + $0x48] sm:$0xff]  ;;  %v1430_v16 = vand.u32 4294901760, %v163_v12  ;;  %v161_v18 = vld [vmem:[%s1845_s1 + $0x40] sm:$0xff]  ;;  %s890_s16 = sshll.u32 %s136_s3, 3 }
  0x16   : > { %v1424_v14 = vsub.f32 %v168_v0, %v1396_v4  ;;  %v1427_v15 = vsub.f32 %v167_v1, %v1398_v5  ;;  %1002 = vmatpush3.msra.mxu0 %v1396_v4  ;;  %v1432_v17 = vand.u32 4294901760, %v162_v13  ;;  %v1438_v19 = vsub.f32 %v166_v6, %v1410_v9  ;;  %s138_s22 = scalar_lea.vmem %s1844_s0, %s890_s16  ;;  %v160_v36 = vld [vmem:[%s1845_s1 + $0x38] sm:$0xff]  ;;  %v159_v37 = vld [vmem:[%s1845_s1 + $0x30] sm:$0xff]  ;;  %v158_v41 = vld [vmem:[%s1845_s1 + $0x28] sm:$0xff]  ;;  %p1260_p13 = pneg %p1259_p12 }
  0x17   : > { %v1441_v20 = vsub.f32 %v165_v7, %v1412_v10  ;;  %v1444_v21 = vsub.f32 %v164_v8, %v1415_v11  ;;  %1003 = vmatprep.subr.mxu0 %v1320_v3  ;;  %v1447_v22 = vand.u32 4294901760, %v161_v18  ;;  %v1455_v25 = vsub.f32 %v163_v12, %v1430_v16  ;;  %v139_v26 = vld [vmem:[%s138_s22] sm:$0xff]  ;;  %v156_v52 = vld [vmem:[%s1845_s1 + $0x18] sm:$0xff]  ;;  %v155_v57 = vld [vmem:[%s1845_s1 + $0x10] sm:$0xff]  ;;  %s896_s22 = sshll.u32 %s1361_s13, 7  ;;  %s1261_s13 = sshll.u32 %s1324_s30, 4  ;;  %s1262_s13 = int_to_ptr.vmem [resolvable:$false] %s1261_s13 }
  0x18   : > { %v263_v23 = vand.u32 4294901760, %v1424_v14  ;;  %v270_v24 = vand.u32 4294901760, %v1427_v15  ;;  %1004 = vmatpush3.msra.mxu0 %v1398_v5  ;;  %v277_v27 = vand.u32 4294901760, %v1438_v19  ;;  %v1462_v29 = vsub.f32 %v162_v13, %v1432_v17  ;;  %143 = vperm.xlu0 %1255, %v139_v26   ;;  %v157_v43 = vld [vmem:[%s1845_s1 + $0x20] sm:$0xff]  ;;  %v154_v0 = vld [vmem:[%s1845_s1 + $0x8] sm:$0xff]  ;;  %s824_s27 = scalar_lea.hbm %s1846_s2, %s896_s22  ;;  %s1263_s3 = scalar_lea.vmem %s1262_s13, 256 }
  0x19   : > { %v284_v28 = vand.u32 4294901760, %v1441_v20  ;;  %1005 = vmatprep.subr.mxu0 %v1320_v3  ;;  %v291_v32 = vand.u32 4294901760, %v1444_v21  ;;  %v298_v34 = vand.u32 4294901760, %v1455_v25  ;;  %v1478_v35 = vsub.f32 %v161_v18, %v1447_v22  ;;  %v153_v12 = vld [vmem:[%s1845_s1] sm:$0xff]  ;;  %p1264_p0 = scmp.lt.s32.totalorder %s827_s24, %s1262_s13  ;;  %p1265_p1 = scmp.lt.s32.totalorder %s1263_s3, %s1257_s29 }
  0x1a   : > { %v264_v30 = vsub.f32 %v1424_v14, %v263_v23  ;;  %v271_v31 = vsub.f32 %v1427_v15, %v270_v24  ;;  %1006 = vmatpush3.msra.mxu0 %v1410_v9  ;;  %v278_v33 = vsub.f32 %v1438_v19, %v277_v27  ;;  %v305_v42 = vand.u32 4294901760, %v1462_v29 }
  0x1b   : > { %1007 = vmatprep.subr.mxu0 %v1320_v3  ;;  %v285_v40 = vsub.f32 %v1441_v20, %v284_v28  ;;  %v1321_v44 = vmov 1   ;;  %v292_v46 = vsub.f32 %v1444_v21, %v291_v32  ;;  %v1501_v47 = vand.u32 4294901760, %v160_v36  ;;  %p1266_p2 = por %p1265_p1, %p1264_p0 }
  0x1c   : > { %v265_v38 = vand.u32 4294901760, %v264_v30  ;;  %v272_v39 = vand.u32 4294901760, %v271_v31  ;;  %1008 = vmatpush3.msra.mxu0 %v1412_v10  ;;  %1256 = vset.pattern.permute.xlu0 %v1321_v44  ;;  %v279_v45 = vand.u32 4294901760, %v278_v33  ;;  %v1503_v48 = vand.u32 4294901760, %v159_v37 }
  0x1d   : > { %1009 = vmatprep.subr.mxu0 %v1320_v3  ;;  %147 = vperm.xlu0 %1256, %v139_v26   ;;  %v299_v49 = vsub.f32 %v1455_v25, %v298_v34  ;;  %v312_v50 = vand.u32 4294901760, %v1478_v35  ;;  %v1510_v51 = vand.u32 4294901760, %v158_v41  ;;  %v286_v53 = vand.u32 4294901760, %v285_v40  ;;  %p1267_p3 = pnand %p1266_p2, %p1260_p13 }
  0x1e   : > { %1037 = vmatpush3.msra.mxu1 %v265_v38  ;;  %v1516_v54 = vsub.f32 %v160_v36, %v1501_v47  ;;  %1010 = vmatpush3.msra.mxu0 %v1415_v11  ;;  %v1520_v55 = vsub.f32 %v159_v37, %v1503_v48  ;;  %v1522_v56 = vand.u32 4294901760, %v157_v43  ;;  %v306_v58 = vsub.f32 %v1462_v29, %v305_v42 }
  0x1f   : > { %1038 = vmatprep.subr.mxu1 %v1320_v3  ;;  %1011 = vmatprep.subr.mxu0 %v1320_v3  ;;  %v293_v59 = vand.u32 4294901760, %v292_v46  ;;  %v1535_v61 = vsub.f32 %v158_v41, %v1510_v51  ;;  %v1537_v62 = vand.u32 4294901760, %v156_v52  ;;  %v1541_v63 = vand.u32 4294901760, %v155_v57 }
  0x20   : > { %1039 = vmatpush3.msra.mxu1 %v272_v39  ;;  %v319_v60 = vand.u32 4294901760, %v1516_v54  ;;  %1012 = vmatpush3.msra.mxu0 %v1430_v16  ;;  %v300_v1 = vand.u32 4294901760, %v299_v49  ;;  %v313_v2 = vsub.f32 %v1478_v35, %v312_v50  ;;  %v326_v6 = vand.u32 4294901760, %v1520_v55 }
  0x21   : > { %1040 = vmatprep.subr.mxu1 %v1320_v3  ;;  %1013 = vmatprep.subr.mxu0 %v1320_v3  ;;  %v1552_v7 = vsub.f32 %v157_v43, %v1522_v56  ;;  %v307_v8 = vand.u32 4294901760, %v306_v58  ;;  %v333_v18 = vand.u32 4294901760, %v1535_v61  ;;  %v1565_v26 = vsub.f32 %v156_v52, %v1537_v62 }
  0x22   : > { %1041 = vmatpush3.msra.mxu1 %v279_v45  ;;  %1014 = vmatpush3.msra.mxu0 %v1432_v17  ;;  %v320_v13 = vsub.f32 %v1516_v54, %v319_v60  ;;  %v1567_v30 = vand.u32 4294901760, %v154_v0  ;;  %v1572_v31 = vsub.f32 %v155_v57, %v1541_v63  ;;  %v314_v33 = vand.u32 4294901760, %v313_v2 }
  0x23   : > { %1042 = vmatprep.subr.mxu1 %v1320_v3  ;;  %1015 = vmatprep.subr.mxu0 %v1320_v3  ;;  %v327_v36 = vsub.f32 %v1520_v55, %v326_v6  ;;  %v340_v37 = vand.u32 4294901760, %v1552_v7  ;;  %v1579_v38 = vand.u32 4294901760, %v153_v12  ;;  %v334_v40 = vsub.f32 %v1535_v61, %v333_v18 }
  0x24   : > { %1043 = vmatpush3.msra.mxu1 %v286_v53  ;;  %1016 = vmatpush3.msra.mxu0 %v1447_v22  ;;  %v321_v39 = vand.u32 4294901760, %v320_v13  ;;  %v347_v41 = vand.u32 4294901760, %v1565_v26  ;;  %v1589_v43 = vsub.f32 %v154_v0, %v1567_v30  ;;  %v354_v44 = vand.u32 4294901760, %v1572_v31 }
  0x25   : > { %1044 = vmatprep.subr.mxu1 %v1320_v3  ;;  %1017 = vmatprep.subr.mxu0 %v1320_v3  ;;  %v328_v45 = vand.u32 4294901760, %v327_v36  ;;  %v341_v46 = vsub.f32 %v1552_v7, %v340_v37  ;;  %v1599_v49 = vsub.f32 %v153_v12, %v1579_v38  ;;  %v335_v52 = vand.u32 4294901760, %v334_v40 }
  0x26   : > { %1045 = vmatpush3.msra.mxu1 %v293_v59  ;;  %1018 = vmatpush3.msra.mxu0 %v1501_v47  ;;  %v348_v53 = vsub.f32 %v1565_v26, %v347_v41  ;;  %v361_v57 = vand.u32 4294901760, %v1589_v43  ;;  %vm1322_vm0 = vmmov 0   ;;  %v355_v59 = vsub.f32 %v1572_v31, %v354_v44 }
  0x27   : > { %1046 = vmatprep.subr.mxu1 %v1320_v3  ;;  %1019 = vmatprep.subr.mxu0 %v1320_v3  ;;  %v342_v58 = vand.u32 4294901760, %v341_v46  ;;  %v368_v0 = vand.u32 4294901760, %v1599_v49  ;;  %v140_v36 = vlaneseq  ;;  %vm810_vm4 = vcmask 392192  }
  0x28   : > { %1047 = vmatpush3.msra.mxu1 %v300_v1  ;;  %1020 = vmatpush3.msra.mxu0 %v1503_v48  ;;  %v349_v1 = vand.u32 4294901760, %v348_v53  ;;  %v362_v2 = vsub.f32 %v1589_v43, %v361_v57  ;;  %v1323_v53 = vmov 1.0  }
  0x29   : > { %1048 = vmatprep.subr.mxu1 %v1320_v3  ;;  %1021 = vmatprep.subr.mxu0 %v1320_v3  ;;  %v369_v12 = vsub.f32 %v1599_v49, %v368_v0  ;;  %v141_v40 = vand.u32 127, %v140_v36 }
  0x2a   : > { %1049 = vmatpush3.msra.mxu1 %v307_v8  ;;  %1022 = vmatpush3.msra.mxu0 %v1510_v51  ;;  %v356_v8 = vand.u32 4294901760, %v355_v59  ;;  %v363_v13 = vand.u32 4294901760, %v362_v2 }
  0x2b   : > { %1050 = vmatprep.subr.mxu1 %v1320_v3  ;;  %1023 = vmatprep.subr.mxu0 %v1320_v3 }
  0x2c   : > { %1051 = vmatpush3.msra.mxu1 %v314_v33  ;;  %1024 = vmatpush3.msra.mxu0 %v1522_v56  ;;  %v370_v33 = vand.u32 4294901760, %v369_v12 }
  0x2d   : > { %1052 = vmatprep.subr.mxu1 %v1320_v3  ;;  %1068 = vmatprep.mubr.msk.f32.mxu1 %vm1322_vm0, %v1320_v3 }
  0x2e   : > { %1053 = vmatpush3.msra.mxu1 %v321_v39  ;;  %1025 = vmatprep.subr.mxu0 %v1320_v3 }
  0x2f   : > { %1054 = vmatprep.subr.mxu1 %v1320_v3  ;;  %1026 = vmatpush3.msra.mxu0 %v1537_v62 }
  0x30   : > { %1055 = vmatpush3.msra.mxu1 %v328_v45  ;;  %1027 = vmatprep.subr.mxu0 %v1320_v3 }
  0x31   : > { %1056 = vmatprep.subr.mxu1 %v1320_v3  ;;  %1028 = vmatpush3.msra.mxu0 %v1541_v63 }
  0x32   : > { %1057 = vmatpush3.msra.mxu1 %v335_v52  ;;  %1029 = vmatprep.subr.mxu0 %v1320_v3 }
  0x33   : > { %1058 = vmatprep.subr.mxu1 %v1320_v3  ;;  %1030 = vmatpush3.msra.mxu0 %v1567_v30 }
  0x34   : > { %1059 = vmatpush3.msra.mxu1 %v342_v58  ;;  %1031 = vmatprep.subr.mxu0 %v1320_v3 }
  0x35   : > { %1060 = vmatprep.subr.mxu1 %v1320_v3  ;;  %1032 = vmatpush3.msra.mxu0 %v1579_v38 }
  0x36   : > { %1061 = vmatpush3.msra.mxu1 %v349_v1  ;;  %1033 = vmatprep.mubr.msk.f32.mxu0 %vm1322_vm0, %v1320_v3 }
  0x37   : > { %1062 = vmatprep.subr.mxu1 %v1320_v3  ;;  %1071 = vmatprep.subr.mxu0 %v1320_v3 }
  0x38   : > { %1063 = vmatpush3.msra.mxu1 %v356_v8 }
  0x39   : > { %1064 = vmatprep.subr.mxu1 %v1320_v3 }
  0x3a   : > { %1065 = vmatpush3.msra.mxu1 %v363_v13 }
  0x3b   : > { %1066 = vmatprep.subr.mxu1 %v1320_v3 }
  0x3c   : > { %1067 = vmatpush3.msra.mxu1 %v370_v33 }
  0x3d   : > { %1106 = vmatprep.subr.mxu1 %v1320_v3 }
  0x93   : > { %v144_v39 = vpop.permute.xlu0 %143 }
  0x94   : > { %vm145_vm1 = vcmp.eq.s32.totalorder %v141_v40, %v144_v39 }
  0x98   : > { %v148_v45 = vpop.permute.xlu0 %147 }
  0x99   : > { %vm149_vm2 = vcmp.eq.s32.totalorder %v141_v40, %v148_v45 }
  0x9a   : > { %vm1639_vm3 = vmor %vm145_vm1, %vm149_vm2 }
  0x9b   : > { %v891_v52 = vsel %vm1639_vm3, 1.0, %v1320_v3  ;;  %1069 = vmatmul.mubr.msk.f32.vlgmr.msra.gmra.mxu1 %vm1639_vm3, %v1323_v53 }
  0x9c   : > { %v1649_v58 = vsub.f32 %v891_v52, %v891_v52  ;;  %1107 = vmatpush3.msra.mxu1 %v1396_v4  ;;  %1138 = vmatprep.mubr.msk.f32.mxu1 %vm1322_vm0, %v1320_v3 }
  0x9d   : > { %1108 = vmatprep.subr.mxu1 %v1320_v3 }
  0x9e   : > { %1109 = vmatpush3.msra.mxu1 %v1398_v5  ;;  %v252_v59 = vand.u32 4294901760, %v1649_v58 }
  0x9f   : > { %1110 = vmatprep.subr.mxu1 %v1320_v3 }
  0xa0   : > { %1111 = vmatpush3.msra.mxu1 %v1410_v9  ;;  %v253_v1 = vsub.f32 %v1649_v58, %v252_v59 }
  0xa1   : > { %1112 = vmatprep.subr.mxu1 %v1320_v3 }
  0xa2   : > { %1113 = vmatpush3.msra.mxu1 %v1412_v10  ;;  %v254_v2 = vand.u32 4294901760, %v253_v1 }
  0xa3   : > { %1114 = vmatprep.subr.mxu1 %v1320_v3 }
  0xa4   : > { %1115 = vmatpush3.msra.mxu1 %v1415_v11  ;;  %1034 = vmatmul.mubr.f32.vlgmr.msra.gmra.mxu0 %v254_v2 }
  0xa5   : > { %1072 = vmatpush3.msra.mxu0 %v1424_v14  ;;  %1116 = vmatprep.subr.mxu1 %v1320_v3 }
  0xa6   : > { %1073 = vmatprep.subr.mxu0 %v1320_v3  ;;  %1117 = vmatpush3.msra.mxu1 %v1430_v16 }
  0xa7   : > { %1074 = vmatpush3.msra.mxu0 %v1427_v15  ;;  %1118 = vmatprep.subr.mxu1 %v1320_v3 }
  0xa8   : > { %1075 = vmatprep.subr.mxu0 %v1320_v3  ;;  %1119 = vmatpush3.msra.mxu1 %v1432_v17 }
  0xa9   : > { %1076 = vmatpush3.msra.mxu0 %v1438_v19  ;;  %1120 = vmatprep.subr.mxu1 %v1320_v3 }
  0xaa   : > { %1077 = vmatprep.subr.mxu0 %v1320_v3  ;;  %1121 = vmatpush3.msra.mxu1 %v1447_v22 }
  0xab   : > { %1078 = vmatpush3.msra.mxu0 %v1441_v20  ;;  %1122 = vmatprep.subr.mxu1 %v1320_v3 }
  0xac   : > { %1079 = vmatprep.subr.mxu0 %v1320_v3  ;;  %1123 = vmatpush3.msra.mxu1 %v1501_v47 }
  0xad   : > { %1080 = vmatpush3.msra.mxu0 %v1444_v21  ;;  %1124 = vmatprep.subr.mxu1 %v1320_v3 }
  0xae   : > { %1081 = vmatprep.subr.mxu0 %v1320_v3  ;;  %1125 = vmatpush3.msra.mxu1 %v1503_v48 }
  0xaf   : > { %1082 = vmatpush3.msra.mxu0 %v1455_v25  ;;  %1126 = vmatprep.subr.mxu1 %v1320_v3 }
  0xb0   : > { %1083 = vmatprep.subr.mxu0 %v1320_v3  ;;  %1127 = vmatpush3.msra.mxu1 %v1510_v51 }
  0xb1   : > { %1084 = vmatpush3.msra.mxu0 %v1462_v29  ;;  %1128 = vmatprep.subr.mxu1 %v1320_v3 }
  0xb2   : > { %1085 = vmatprep.subr.mxu0 %v1320_v3  ;;  %1129 = vmatpush3.msra.mxu1 %v1522_v56 }
  0xb3   : > { %1086 = vmatpush3.msra.mxu0 %v1478_v35  ;;  %1130 = vmatprep.subr.mxu1 %v1320_v3 }
  0xb4   : > { %1087 = vmatprep.subr.mxu0 %v1320_v3  ;;  %1131 = vmatpush3.msra.mxu1 %v1537_v62 }
  0xb5   : > { %1088 = vmatpush3.msra.mxu0 %v1516_v54  ;;  %1132 = vmatprep.subr.mxu1 %v1320_v3 }
  0xb6   : > { %1089 = vmatprep.subr.mxu0 %v1320_v3  ;;  %1133 = vmatpush3.msra.mxu1 %v1541_v63 }
  0xb7   : > { %1090 = vmatpush3.msra.mxu0 %v1520_v55  ;;  %1134 = vmatprep.subr.mxu1 %v1320_v3 }
  0xb8   : > { %1091 = vmatprep.subr.mxu0 %v1320_v3  ;;  %1135 = vmatpush3.msra.mxu1 %v1567_v30 }
  0xb9   : > { %1092 = vmatpush3.msra.mxu0 %v1535_v61  ;;  %1136 = vmatprep.subr.mxu1 %v1320_v3 }
  0xba   : > { %1093 = vmatprep.subr.mxu0 %v1320_v3  ;;  %1137 = vmatpush3.msra.mxu1 %v1579_v38 }
  0xbb   : > { %1094 = vmatpush3.msra.mxu0 %v1552_v7  ;;  %1139 = vmatmul.mubr.f32.vlgmr.msra.gmra.mxu1 %v252_v59 }
  0xbc   : > { %1176 = vmatprep.subr.mxu1 %v1320_v3  ;;  %1095 = vmatprep.subr.mxu0 %v1320_v3 }
  0xbd   : > { %1177 = vmatpush3.msra.mxu1 %v1396_v4  ;;  %1096 = vmatpush3.msra.mxu0 %v1565_v26 }
  0xbe   : > { %1178 = vmatprep.subr.mxu1 %v1320_v3  ;;  %1097 = vmatprep.subr.mxu0 %v1320_v3 }
  0xbf   : > { %1179 = vmatpush3.msra.mxu1 %v1398_v5  ;;  %1098 = vmatpush3.msra.mxu0 %v1572_v31 }
  0xc0   : > { %1180 = vmatprep.subr.mxu1 %v1320_v3  ;;  %1099 = vmatprep.subr.mxu0 %v1320_v3 }
  0xc1   : > { %1181 = vmatpush3.msra.mxu1 %v1410_v9  ;;  %1100 = vmatpush3.msra.mxu0 %v1589_v43 }
  0xc2   : > { %1182 = vmatprep.subr.mxu1 %v1320_v3  ;;  %1101 = vmatprep.subr.mxu0 %v1320_v3 }
  0xc3   : > { %1183 = vmatpush3.msra.mxu1 %v1412_v10  ;;  %1102 = vmatpush3.msra.mxu0 %v1599_v49 }
  0xc4   : > { %1103 = vmatprep.mubr.msk.f32.mxu0 %vm1322_vm0, %v1320_v3  ;;  %1184 = vmatprep.subr.mxu1 %v1320_v3 }
  0xc5   : > { %1104 = vmatmul.mubr.f32.vlgmr.msra.gmra.mxu0 %v1649_v58  ;;  %1141 = vmatprep.subr.mxu0 %v1320_v3 }
  0xc6   : > { %1185 = vmatpush3.msra.mxu1 %v1415_v11  ;;  %1142 = vmatpush3.msra.mxu0 %v263_v23 }
  0xc7   : > { %1186 = vmatprep.subr.mxu1 %v1320_v3  ;;  %1143 = vmatprep.subr.mxu0 %v1320_v3 }
  0xc8   : > { %1187 = vmatpush3.msra.mxu1 %v1430_v16  ;;  %1144 = vmatpush3.msra.mxu0 %v270_v24 }
  0xc9   : > { %1188 = vmatprep.subr.mxu1 %v1320_v3  ;;  %1145 = vmatprep.subr.mxu0 %v1320_v3 }
  0xca   : > { %1189 = vmatpush3.msra.mxu1 %v1432_v17  ;;  %1146 = vmatpush3.msra.mxu0 %v277_v27 }
  0xcb   : > { %1190 = vmatprep.subr.mxu1 %v1320_v3  ;;  %1147 = vmatprep.subr.mxu0 %v1320_v3 }
  0xcc   : > { %1191 = vmatpush3.msra.mxu1 %v1447_v22  ;;  %1148 = vmatpush3.msra.mxu0 %v284_v28 }
  0xcd   : > { %1192 = vmatprep.subr.mxu1 %v1320_v3  ;;  %1149 = vmatprep.subr.mxu0 %v1320_v3 }
  0xce   : > { %1193 = vmatpush3.msra.mxu1 %v1501_v47  ;;  %1150 = vmatpush3.msra.mxu0 %v291_v32 }
  0xcf   : > { %1194 = vmatprep.subr.mxu1 %v1320_v3  ;;  %1151 = vmatprep.subr.mxu0 %v1320_v3 }
  0xd0   : > { %1195 = vmatpush3.msra.mxu1 %v1503_v48  ;;  %1152 = vmatpush3.msra.mxu0 %v298_v34 }
  0xd1   : > { %1196 = vmatprep.subr.mxu1 %v1320_v3  ;;  %1153 = vmatprep.subr.mxu0 %v1320_v3 }
  0xd2   : > { %1197 = vmatpush3.msra.mxu1 %v1510_v51  ;;  %1154 = vmatpush3.msra.mxu0 %v305_v42 }
  0xd3   : > { %1198 = vmatprep.subr.mxu1 %v1320_v3  ;;  %1155 = vmatprep.subr.mxu0 %v1320_v3 }
  0xd4   : > { %1199 = vmatpush3.msra.mxu1 %v1522_v56  ;;  %1156 = vmatpush3.msra.mxu0 %v312_v50 }
  0xd5   : > { %1200 = vmatprep.subr.mxu1 %v1320_v3  ;;  %1157 = vmatprep.subr.mxu0 %v1320_v3 }
  0xd6   : > { %1201 = vmatpush3.msra.mxu1 %v1537_v62  ;;  %1158 = vmatpush3.msra.mxu0 %v319_v60 }
  0xd7   : > { %1202 = vmatprep.subr.mxu1 %v1320_v3  ;;  %1159 = vmatprep.subr.mxu0 %v1320_v3 }
  0xd8   : > { %1203 = vmatpush3.msra.mxu1 %v1541_v63  ;;  %1160 = vmatpush3.msra.mxu0 %v326_v6 }
  0xd9   : > { %1204 = vmatprep.subr.mxu1 %v1320_v3  ;;  %1161 = vmatprep.subr.mxu0 %v1320_v3 }
  0xda   : > { %1205 = vmatpush3.msra.mxu1 %v1567_v30  ;;  %1162 = vmatpush3.msra.mxu0 %v333_v18 }
  0xdb   : > { %1206 = vmatprep.subr.mxu1 %v1320_v3  ;;  %1163 = vmatprep.subr.mxu0 %v1320_v3 }
  0xdc   : > { %1207 = vmatpush3.msra.mxu1 %v1579_v38  ;;  %1208 = vmatprep.mubr.msk.f32.mxu1 %vm1322_vm0, %v1320_v3 }
  0xdd   : > { %1164 = vmatpush3.msra.mxu0 %v340_v37  ;;  %1209 = vmatmul.mubr.msk.f32.vlgmr.msra.gmra.mxu1 %vm1639_vm3, %v1323_v53 }
  0xde   : > { %1165 = vmatprep.subr.mxu0 %v1320_v3  ;;  %1173 = vmatprep.mubr.msk.f32.mxu0 %vm1322_vm0, %v1320_v3 }
  0xdf   : > { %1166 = vmatpush3.msra.mxu0 %v347_v41 }
  0xe0   : > { %1167 = vmatprep.subr.mxu0 %v1320_v3 }
  0xe1   : > { %1168 = vmatpush3.msra.mxu0 %v354_v44 }
  0xe2   : > { %1169 = vmatprep.subr.mxu0 %v1320_v3 }
  0xe3   : > { %1170 = vmatpush3.msra.mxu0 %v361_v57 }
  0xe4   : > { %1171 = vmatprep.subr.mxu0 %v1320_v3 }
  0xe5   : > { %1172 = vmatpush3.msra.mxu0 %v368_v0 }
  0xe6   : > { %1174 = vmatmul.mubr.msk.f32.vlgmr.msra.gmra.mxu0 %vm1639_vm3, %v1323_v53 }
 0x15b   : > { %v407_v4 = vpop.f32.mrf.mxu1 }
 0x15d   : > { %v1070_v5 = vpop.f32.mrf.mxu1 }
 0x164   : > { %v256_v9 = vpop.f32.mrf.mxu0 }
 0x165   : > { %v408_v19 = vadd.f32 %v407_v4, %v256_v9 }
 0x166   : > { %v1035_v10 = vpop.f32.mrf.mxu0 }
 0x17b   : > { %v600_v11 = vpop.f32.mrf.mxu1 }
 0x17d   : > { %v1140_v14 = vpop.f32.mrf.mxu1 }
 0x185   : > { %v511_v15 = vpop.f32.mrf.mxu0 }
 0x186   : > { %v512_v20 = vadd.f32 %v511_v15, %v408_v19 }
 0x187   : > { %v1105_v16 = vpop.f32.mrf.mxu0 }
 0x188   : > { %v601_v21 = vadd.f32 %v600_v11, %v512_v20 }
 0x19d   : > { %v806_v17 = vpop.f32.mrf.mxu1 }
 0x19f   : > { %v1210_v3 = vpop.f32.mrf.mxu1 }
 0x1a6   : > { %v719_v22 = vpop.f32.mrf.mxu0 }
 0x1a7   : > { %v720_v23 = vadd.f32 %v719_v22, %v601_v21 }
 0x1a8   : > { %v1175_v24 = vpop.f32.mrf.mxu0 }
 0x1a9   : > { %v807_v25 = vadd.f32 %v806_v17, %v720_v23 }
 0x1ab   : > { %811 = vst.msk [vmem:[%s134_s23] sm:$0xff] %vm810_vm4, %v807_v25 }
 0x1ac   : > { %1270 = shalt.err (!%p1267_p3)
}
 0x1ad   : > { %s1271_s4 = scalar_lea.hbm %s824_s27, 128  ;;  %s1275_s7 = scalar_lea.hbm %s1846_s2, 256 }
 0x1ae   : > { %p1272_p4 = scmp.ne.s32.totalorder %s824_s27, %s1271_s4  ;;  %p1276_p9 = scmp.lt.s32.totalorder %s824_s27, %s1846_s2 }
 0x1af   : > { %p1277_p10 = scmp.lt.s32.totalorder %s1275_s7, %s1271_s4 }
 0x1b0   : > { %p1273_p7 = pnand %p1272_p4, %p1378_p5 }
 0x1b1   : > { %p1278_p11 = por %p1277_p10, %p1276_p9 }
 0x1b2   : > { %p1274_p8 = pneg %p1273_p7 }
 0x1b4   : > { %p1279_p12 = pnand %p1278_p11, %p1274_p8 }
 0x1b6   : > { %1282 = shalt.err (!%p1279_p12)
}
 0x1b7   : > { %1211 = dma.vmem_to_hbm [thread:$0]  (%p1378_p5), %s827_s24, 128, %s824_s27, %s813_s28  }
 0x1b8 PF: > { %p1217_p13 = scmp.ge.s32.totalorder %s1317_s12, 2  ;;  %s838_s16 = sand.u32 1, %s1305_s9  }
 0x1b9   : > { %s839_s17 = scalar_lea.sflag [#allocation3], %s838_s16 }
 0x1ba   : > { %p1214_p0 = pnand %p1217_p13, %p1382_p6 }
 0x1bc   : > { %p1215_p1 = pneg %p1214_p0 }
 0x1be   : > { %1300 = dma.done.wait (%p1215_p1), %s839_s17, 128  }
 0x1bf   : > { %1302 = vsyncadd (%p1215_p1), %s839_s17, 4294967168  ;;  %p12_p2 = scmp.ge.s32.totalorder %s1365_s15, 4   ;;  %s1851_s9 = smov %s1309_s10 }
 0x1c0   : > { %s1852_s10 = smov %s1313_s11  ;;  %s1853_s11 = smov %s1376_s18 }
 0x1c1   : > { %s1854_s12 = smov %s1365_s15  ;;  %14 = sbr.rel (!%p12_p2) target bundleno = 3 (0x3), region = 63 }
 0x1c6   :  { %844 = vsyncpa [#allocation3], 1 }
 0x1c7   :  { %846 = vsyncpa [#allocation3 + $0x1], 1 }

</bundles_post_ra>
